<compile_context>
chip_gen: v7x
topology: tpu7x:2x2x1
jax: 0.10.0
libtpu: 0.0.40
codegen_flags: <defaults>
</compile_context>

<pallas_src>
import jax
import jax.numpy as jnp
from jax.experimental import pallas as pl
from jax.experimental.pallas import tpu as pltpu


# --------------------------------------------------------------------------- kernels
def _var_kernel(w_ref, m_ref, x_ref, ss_ref):
    """Accumulate per-row centered sum-of-squares of Y = W @ X across all tiles.

    w_ref : [Ck, Cin]    rows ordered (cout, kd, kh, kw)
    m_ref : [Ck, 1]      per-channel mean broadcast to its k^3 rows
    x_ref : [Cin, Ts]    one (n, s) tile of X
    ss_ref: [Ck, 1]      resident accumulator (constant output block index)
    """
    @pl.when((pl.program_id(0) == 0) & (pl.program_id(1) == 0))
    def _():
        ss_ref[...] = jnp.zeros_like(ss_ref)

    y = jnp.dot(w_ref[...], x_ref[...], preferred_element_type=jnp.float32)
    yc = y - m_ref[...]                                        # center (channel mean)
    ss_ref[...] += jnp.sum(yc * yc, axis=1, keepdims=True)     # lane reduce only


def _apply_kernel(w_ref, scale_ref, shift_ref, x_ref, o_ref):
    """o = relu((W @ X) * scale + shift) for one (n, s) tile; lane-dense store."""
    y = jnp.dot(w_ref[...], x_ref[...], preferred_element_type=jnp.float32)
    o_ref[...] = jnp.maximum(y * scale_ref[...] + shift_ref[...], 0.0)


# --------------------------------------------------------------------------- wrapper
def _choose_tile(s):
    """Largest multiple of 128 that divides S (capped), else the full extent."""
    for t in (2048, 1024, 512, 256, 128):
        if s % t == 0:
            return t
    return s   # full-extent last dim is always allowed by the (8,128) rule


def generater_block_forward(x, w_t, b_t, gamma, beta, kernel, stride, eps=1e-5):
    """x: [N, Cin, D, H, W] (NCDHW).  w_t: [Cin, Cout, k, k, k] (torch layout)."""
    N, Cin, D, H, W = x.shape
    Cout = w_t.shape[1]
    k, s = kernel, stride
    # TODO(synk): stride != kernel needs the overlapping (im2col) transposed-conv path.
    assert k == s, "fast path requires stride == kernel (non-overlapping blocks)"

    k3 = k * k * k
    Ck = Cout * k3
    S = D * H * W
    count = N * S * k3                      # elements per BN channel
    inv_count = 1.0 / count
    tile_s = _choose_tile(S)
    n_s = S // tile_s
    f32 = jnp.float32

    # ---- glue (cheap): contiguous reshapes only, no pad / transpose over X ----------
    x3 = x.reshape(N, Cin, S).astype(f32)               # [N, Cin, S]
    w_mat = w_t.reshape(Cin, Ck).T.astype(f32)          # [Ck, Cin] rows (co,kd,kh,kw)
    # b_t intentionally unused: per-channel constant cancels in training-mode BN.

    # ---- channel mean without touching Y:  sum_m (W@X) == W @ sum_m(X) --------------
    col_sum = jnp.sum(x3, axis=(0, 2))                                  # [Cin]
    row_sum = w_mat @ col_sum                                           # [Ck]
    mean_ch = row_sum.reshape(Cout, k3).sum(axis=1) * inv_count         # [Cout]
    mean_row = jnp.repeat(mean_ch, k3).reshape(Ck, 1)                   # [Ck, 1]

    x_spec = pl.BlockSpec((None, Cin, tile_s), lambda n, si: (n, 0, si))
    w_spec = pl.BlockSpec((Ck, Cin), lambda n, si: (0, 0))
    col_spec = pl.BlockSpec((Ck, 1), lambda n, si: (0, 0))

    # ---- pass 1: centered sum-of-squares (two-pass variance, sequential grid) -------
    ss_row = pl.pallas_call(
        _var_kernel,
        out_shape=jax.ShapeDtypeStruct((Ck, 1), f32),
        grid_spec=pltpu.PrefetchScalarGridSpec(
            num_scalar_prefetch=0, grid=(N, n_s),
            in_specs=[w_spec, col_spec, x_spec],
            out_specs=col_spec),
        compiler_params=pltpu.CompilerParams(
            dimension_semantics=("arbitrary", "arbitrary")),
    )(w_mat, mean_row, x3)

    var_ch = ss_row[:, 0].reshape(Cout, k3).sum(axis=1) * inv_count     # [Cout]
    scale_ch = gamma.astype(f32) * jax.lax.rsqrt(var_ch + eps)
    shift_ch = beta.astype(f32) - mean_ch * scale_ch
    scale_row = jnp.repeat(scale_ch, k3).reshape(Ck, 1)
    shift_row = jnp.repeat(shift_ch, k3).reshape(Ck, 1)

    # ---- pass 2: y = W@X tile, normalize, ReLU; lane-dense [N, Ck, S] output --------
    # VMEM per step ~ 2*(Cin + 2*Ck)*tile_s*4 B  (<1 MiB at these shapes) -> fits the
    # default scoped limits on v5e / v6e / v7x without flags.
    y_blk = pl.pallas_call(
        _apply_kernel,
        out_shape=jax.ShapeDtypeStruct((N, Ck, S), f32),
        grid_spec=pltpu.PrefetchScalarGridSpec(
            num_scalar_prefetch=0, grid=(N, n_s),
            in_specs=[w_spec, col_spec, col_spec, x_spec],
            out_specs=pl.BlockSpec((None, Ck, tile_s), lambda n, si: (n, 0, si))),
        compiler_params=pltpu.CompilerParams(
            dimension_semantics=("parallel", "parallel")),
    )(w_mat, scale_row, shift_row, x3)

    # ---- scatter the non-overlapping k^3 blocks back to NCDHW -----------------------
    # TODO(synk): a consumer that accepts the (N, Cout, k,k,k, D,H,W) block view could
    # skip this extra XLA pass over the output (the strided interleave is not
    # expressible in a BlockSpec); bf16 output would halve this traffic if tolerated.
    y = y_blk.reshape(N, Cout, k, k, k, D, H, W)
    y = jnp.transpose(y, (0, 1, 5, 2, 6, 3, 7, 4))   # [N,Cout,D,kd,H,kh,W,kw]
    return y.reshape(N, Cout, D * k, H * k, W * k)


# --------------------------------------------------------------------------- reference
def _reference(x, w_t, b_t, gamma, beta, kernel, stride, eps=1e-5):
    """Pure-JAX reference of the PyTorch forward pass (training-mode BN)."""
    k, s = kernel, stride
    w_conv = jnp.transpose(w_t[:, :, ::-1, ::-1, ::-1], (1, 0, 2, 3, 4))
    y = jax.lax.conv_general_dilated(
        x, w_conv, window_strides=(1, 1, 1),
        padding=[(k - 1, k - 1)] * 3, lhs_dilation=(s, s, s),
        dimension_numbers=('NCDHW', 'OIDHW', 'NCDHW'))
    y = y + b_t.reshape(1, -1, 1, 1, 1)
    mean = y.mean(axis=(0, 2, 3, 4), keepdims=True)
    var = y.var(axis=(0, 2, 3, 4), keepdims=True)      # biased, BatchNorm training
    yn = (y - mean) / jnp.sqrt(var + eps)
    yn = yn * gamma.reshape(1, -1, 1, 1, 1) + beta.reshape(1, -1, 1, 1, 1)
    return jnp.maximum(yn, 0.0)


if __name__ == "__main__":
    # Module config: GeneraterBlock(in_dim=4, out_dim=8, kernel=2, stride=2)
    in_dim, out_dim, kernel, stride = 4, 8, 2, 2
    N, D, H, W = 2, 8, 8, 8

    key = jax.random.PRNGKey(0)
    kx, kw, kb = jax.random.split(key, 3)
    x = jax.random.normal(kx, (N, in_dim, D, H, W), dtype=jnp.float32)
    # ConvTranspose3d weight: [Cin, Cout, k, k, k]; bias: [Cout]
    w_t = jax.random.normal(kw, (in_dim, out_dim, kernel, kernel, kernel),
                            dtype=jnp.float32) * 0.1
    b_t = jax.random.normal(kb, (out_dim,), dtype=jnp.float32) * 0.1
    # BatchNorm3d default init: weight=1, bias=0
    gamma = jnp.ones((out_dim,), dtype=jnp.float32)
    beta = jnp.zeros((out_dim,), dtype=jnp.float32)

    out = generater_block_forward(x, w_t, b_t, gamma, beta, kernel, stride)
    out = jax.block_until_ready(out)

    ref = _reference(x, w_t, b_t, gamma, beta, kernel, stride)
    assert out.shape == ref.shape, (out.shape, ref.shape)
    assert jnp.allclose(out, ref, atol=1e-4, rtol=1e-4), \
        float(jnp.max(jnp.abs(out - ref)))

    print("KERNEL_OK")
</pallas_src>

<mosaic_0001>
module attributes {stable_mosaic.version = 11 : i64} {
  func.func @_var_kernel(%arg0: i32, %arg1: i32, %arg2: memref<64x4xf32, #tpu.memory_space<vmem>>, %arg3: memref<64x1xf32, #tpu.memory_space<vmem>>, %arg4: memref<1x4x512xf32, #tpu.memory_space<vmem>>, %arg5: memref<64x1xf32, #tpu.memory_space<vmem>>) attributes {dimension_semantics = [#tpu.dimension_semantics<arbitrary>, #tpu.dimension_semantics<arbitrary>], iteration_bounds = array<i64: 2, 1>, scalar_prefetch = 0 : i64, scratch_operands = 0 : i64, tpu.core_type = #tpu.core_type<tc>, window_params = [{pipeline_mode = #tpu.pipeline_mode<synchronous>, transform_indices = @transform_0, window_bounds = array<i64: 64, 4>}, {pipeline_mode = #tpu.pipeline_mode<synchronous>, transform_indices = @transform_1, window_bounds = array<i64: 64, 1>}, {transform_indices = @transform_2, window_bounds = array<i64: 1, 4, 512>}, {pipeline_mode = #tpu.pipeline_mode<synchronous>, transform_indices = @transform_3, window_bounds = array<i64: 64, 1>}]} {
    %c0_i32 = arith.constant 0 : i32
    %0 = arith.cmpi eq, %arg0, %c0_i32 : i32
    %c0_i32_0 = arith.constant 0 : i32
    %1 = arith.cmpi eq, %arg1, %c0_i32_0 : i32
    %2 = arith.andi %0, %1 : i1
    %3 = arith.extui %2 : i1 to i32
    %c0_i32_1 = arith.constant 0 : i32
    %4 = arith.cmpi ne, %3, %c0_i32_1 : i32
    scf.if %4 {
      %cst_13 = arith.constant 0.000000e+00 : f32
      %18 = vector.broadcast %cst_13 : f32 to vector<64x1xf32>
      %c0_14 = arith.constant 0 : index
      %c0_15 = arith.constant 0 : index
      %19 = vector.load %arg5[%c0_14, %c0_15] : memref<64x1xf32, #tpu.memory_space<vmem>>, vector<64x1xf32>
      tpu.vector_store %arg5[%c0_14, %c0_15], %18 {strides = array<i32>} : memref<64x1xf32, #tpu.memory_space<vmem>>, vector<64x1xf32>,
    } else {
    }
    %c0 = arith.constant 0 : index
    %c0_2 = arith.constant 0 : index
    %5 = vector.load %arg2[%c0, %c0_2] : memref<64x4xf32, #tpu.memory_space<vmem>>, vector<64x4xf32>
    %c0_3 = arith.constant 0 : index
    %c0_4 = arith.constant 0 : index
    %c0_5 = arith.constant 0 : index
    %6 = vector.load %arg4[%c0_3, %c0_4, %c0_5] : memref<1x4x512xf32, #tpu.memory_space<vmem>>, vector<1x4x512xf32>
    %7 = vector.shape_cast %6 : vector<1x4x512xf32> to vector<4x512xf32>
    %cst = arith.constant dense<0.000000e+00> : vector<64x512xf32>
    %8 = tpu.matmul %5, %7, %cst {dimension_numbers = #tpu.dot_dimension_numbers<[1], [0], [0], [1], [0, 0, 1, 1], [], []>} : vector<64x4xf32>, vector<4x512xf32>, vector<64x512xf32> -> vector<64x512xf32>
    %c0_6 = arith.constant 0 : index
    %c0_7 = arith.constant 0 : index
    %9 = vector.load %arg3[%c0_6, %c0_7] : memref<64x1xf32, #tpu.memory_space<vmem>>, vector<64x1xf32>
    %10 = vector.broadcast %9 : vector<64x1xf32> to vector<64x512xf32>
    %11 = arith.subf %8, %10 : vector<64x512xf32>
    %c0_8 = arith.constant 0 : index
    %c0_9 = arith.constant 0 : index
    %12 = vector.load %arg5[%c0_8, %c0_9] : memref<64x1xf32, #tpu.memory_space<vmem>>, vector<64x1xf32>
    %13 = arith.mulf %11, %11 : vector<64x512xf32>
    %cst_10 = arith.constant dense<0.000000e+00> : vector<64xf32>
    %14 = vector.multi_reduction <add>, %13, %cst_10 [1] : vector<64x512xf32> to vector<64xf32>
    %15 = vector.shape_cast %14 : vector<64xf32> to vector<64x1xf32>
    %16 = arith.addf %12, %15 : vector<64x1xf32>
    %c0_11 = arith.constant 0 : index
    %c0_12 = arith.constant 0 : index
    %17 = vector.load %arg5[%c0_11, %c0_12] : memref<64x1xf32, #tpu.memory_space<vmem>>, vector<64x1xf32>
    tpu.vector_store %arg5[%c0_11, %c0_12], %16 {strides = array<i32>} : memref<64x1xf32, #tpu.memory_space<vmem>>, vector<64x1xf32>,
    return
  }
  func.func @transform_0(%arg0: i32, %arg1: i32) -> (i32, i32) {
    %c0_i32 = arith.constant 0 : i32
    %c0_i32_0 = arith.constant 0 : i32
    %c0_i32_1 = arith.constant 0 : i32
    return %c0_i32, %c0_i32_0 : i32, i32
  }
  func.func @transform_1(%arg0: i32, %arg1: i32) -> (i32, i32) {
    %c0_i32 = arith.constant 0 : i32
    %c0_i32_0 = arith.constant 0 : i32
    %c0_i32_1 = arith.constant 0 : i32
    return %c0_i32, %c0_i32_0 : i32, i32
  }
  func.func @transform_2(%arg0: i32, %arg1: i32) -> (i32, i32, i32) {
    %c0_i32 = arith.constant 0 : i32
    %c0_i32_0 = arith.constant 0 : i32
    return %arg0, %c0_i32, %arg1 : i32, i32, i32
  }
  func.func @transform_3(%arg0: i32, %arg1: i32) -> (i32, i32) {
    %c0_i32 = arith.constant 0 : i32
    %c0_i32_0 = arith.constant 0 : i32
    %c0_i32_1 = arith.constant 0 : i32
    return %c0_i32, %c0_i32_0 : i32, i32
  }
}

</mosaic_0001>

<bundles_post_ra>
// kernel: tpu_custom_call.1
= control target key start
LH: loop header
LB: loop body
LE: loop exit
PB: predicated region body
PF: predicated region fallthrough
CT: control target
= control target key end

     0   :  { %s801_s12 = smov 0   ;;  %s803_s13 = smov 0   ;;  %s975_s0 = inlined_call_operand.vmem [shape: f32[64,4], index: 0, kind: input, shape index: {}]   ;;  %s976_s1 = inlined_call_operand.vmem [shape: f32[64,1], index: 1, kind: input, shape index: {}]   ;;  %s977_s2 = inlined_call_operand.vmem [shape: f32[2,4,512], index: 2, kind: input, shape index: {}]   ;;  %s978_s3 = inlined_call_operand.vmem [shape: f32[64,1], index: 3, kind: output, shape index: {}]  }
   0x1   :  { %s805_s14 = smov 0  }
   0x2 LB: > { %s25_s15 = sadd.s32 1, %s772_s13  ;;  %p695_p0 = scmp.ge.s32.totalorder %s776_s14, 1  ;;  %s776_s14 = sphi %s805_s14, %s13_s14   ;;  %s772_s13 = sphi %s803_s13, %s980_s13   ;;  %s768_s12 = sphi %s801_s12, %s979_s12  }
   0x3   : > { %p27_p1 = scmp.ge.s32.totalorder %s25_s15, 2  ;;  %p151_p2 = scmp.lt.s32.totalorder %s776_s14, 3 }
   0x5   : > { %s982_s15 = smov (%p27_p1, %s25_s15), 0  ;;  %p152_p3 = pnand %p695_p0, %p151_p2 }
   0x6   : > { %p175_p4 = scmp.lt.s32.totalorder (!%p152_p3), %s768_s12, 1  ;;  %p184_p5 = scmp.eq.s32.totalorder (!%p152_p3), %s768_s12, 0 }
   0x7   : > { %155 = sbr.rel (%p152_p3) target bundleno = 422 (0x1a6), region = 32 }
   0xe   : > { %s984_s12 = smov (!%p175_p4, %s768_s12), 1  ;;  %189 = sbr.rel (!%p184_p5) target bundleno = 21 (0x15), region = 36 }
   0xf   : > { %s721_s16 = sshll.u32 %s984_s12, 4  ;;  %vm190_vm0 = vcmask (%p184_p5), 7168   ;;  %v778_v0 = vmov (%p184_p5), 0.0  }
  0x10   : > { %s182_s19 = scalar_lea.vmem %s977_s2, %s721_s16  ;;  %191 = vst.msk [vmem:[%s978_s3] sm:$0xff] (%p184_p5), %vm190_vm0, %v778_v0  ;;  %192 = vst.msk [vmem:[%s978_s3 + $0x8] sm:$0xff] (%p184_p5), %vm190_vm0, %v778_v0 }
  0x11   : > { %193 = vst.msk [vmem:[%s978_s3 + $0x10] sm:$0xff] (%p184_p5), %vm190_vm0, %v778_v0  ;;  %194 = vst.msk [vmem:[%s978_s3 + $0x18] sm:$0xff] (%p184_p5), %vm190_vm0, %v778_v0 }
  0x12   : > { %195 = vst.msk [vmem:[%s978_s3 + $0x20] sm:$0xff] (%p184_p5), %vm190_vm0, %v778_v0  ;;  %196 = vst.msk [vmem:[%s978_s3 + $0x28] sm:$0xff] (%p184_p5), %vm190_vm0, %v778_v0 }
  0x13   : > { %197 = vst.msk [vmem:[%s978_s3 + $0x30] sm:$0xff] (%p184_p5), %vm190_vm0, %v778_v0  ;;  %198 = vst.msk [vmem:[%s978_s3 + $0x38] sm:$0xff] (%p184_p5), %vm190_vm0, %v778_v0 }
  0x15 PF: > { %v207_v1 = vld [vmem:[%s182_s19] sm:$0xff]  ;;  %vm238_vm1 = vcmask 1043456   ;;  %v208_v2 = vld [vmem:[%s182_s19 + $0x8] sm:$0xff]  ;;  %v779_v5 = vmov 0.0   ;;  %vm213_vm2 = vcmask 31744   ;;  %v780_v7 = vmov 0  }
  0x16   : > { %v211_v3 = vcombine.high %v207_v1, %v207_v1  ;;  %v212_v4 = vcombine.high %v208_v2, %v208_v2  ;;  %311 = vmatprep.mubr.f32.mxu0 %v779_v5  ;;  %424 = vmatprep.mubr.f32.mxu1 %v779_v5  ;;  %v199_v6 = vld [vmem:[%s975_s0] sm:$0xff]  ;;  %v475_v9 = vld [vmem:[%s976_s1 + $0x10] sm:$0xff]  ;;  %v200_v10 = vld [vmem:[%s975_s0 + $0x8] sm:$0xff]  ;;  %vm641_vm3 = vcmask 7168  }
  0x17   : > { %750 = vset.pattern.permute.xlu0 %v780_v7  ;;  %751 = vset.pattern.permute.xlu1 %v780_v7  ;;  %v473_v8 = vld [vmem:[%s976_s1] sm:$0xff]  ;;  %v474_v11 = vld [vmem:[%s976_s1 + $0x8] sm:$0xff]  ;;  %v476_v12 = vld [vmem:[%s976_s1 + $0x18] sm:$0xff] }
  0x18   : > { %699 = vmatprep.subr.msk.mxu0 %vm238_vm1, %v211_v3  ;;  %709 = vmatprep.subr.msk.mxu1 %vm238_vm1, %v212_v4  ;;  %v201_v13 = vld [vmem:[%s975_s0 + $0x10] sm:$0xff]  ;;  %v477_v14 = vld [vmem:[%s976_s1 + $0x20] sm:$0xff]  ;;  %v478_v15 = vld [vmem:[%s976_s1 + $0x28] sm:$0xff] }
  0x19   : > { %700 = vmatpush1.msk.msra.mxu0 %vm238_vm1, %v207_v1  ;;  %710 = vmatpush1.msk.msra.mxu1 %vm238_vm1, %v208_v2  ;;  %v202_v16 = vld [vmem:[%s975_s0 + $0x18] sm:$0xff]  ;;  %v479_v17 = vld [vmem:[%s976_s1 + $0x30] sm:$0xff]  ;;  %v203_v19 = vld [vmem:[%s975_s0 + $0x20] sm:$0xff] }
  0x1a   : > { %701 = vmatmul.mubr.msk.f32.vlgmr.msra.gmra.mrb[0].mxu0 %vm213_vm2, %v199_v6  ;;  %711 = vmatmul.mubr.msk.f32.vlgmr.msra.gmra.mrb[0].mxu1 %vm213_vm2, %v199_v6  ;;  %v480_v18 = vld [vmem:[%s976_s1 + $0x38] sm:$0xff]  ;;  %v204_v20 = vld [vmem:[%s975_s0 + $0x28] sm:$0xff]  ;;  %v205_v21 = vld [vmem:[%s975_s0 + $0x30] sm:$0xff] }
  0x1b   : > { %317 = vmatprep.mubr.f32.mxu0 %v779_v5  ;;  %430 = vmatprep.mubr.f32.mxu1 %v779_v5  ;;  %v206_v22 = vld [vmem:[%s975_s0 + $0x38] sm:$0xff] }
  0x1c   : > { %483 = vperm.xlu0 %750, %v473_v8   ;;  %493 = vperm.xlu1 %751, %v475_v9  }
  0x1e   : > { %702 = vmatmul.mubr.msk.f32.gmra.mrb[2].mxu0 %vm213_vm2, %v200_v10  ;;  %712 = vmatmul.mubr.msk.f32.gmra.mrb[2].mxu1 %vm213_vm2, %v200_v10 }
  0x1f   : > { %323 = vmatprep.mubr.f32.mxu0 %v779_v5  ;;  %436 = vmatprep.mubr.f32.mxu1 %v779_v5 }
  0x20   : > { %488 = vperm.xlu0 %750, %v474_v11   ;;  %498 = vperm.xlu1 %751, %v476_v12  }
  0x22   : > { %703 = vmatmul.mubr.msk.f32.gmra.mrb[4].mxu0 %vm213_vm2, %v201_v13  ;;  %713 = vmatmul.mubr.msk.f32.gmra.mrb[4].mxu1 %vm213_vm2, %v201_v13 }
  0x23   : > { %329 = vmatprep.mubr.f32.mxu0 %v779_v5  ;;  %442 = vmatprep.mubr.f32.mxu1 %v779_v5 }
  0x24   : > { %503 = vperm.xlu0 %750, %v477_v14   ;;  %508 = vperm.xlu1 %751, %v478_v15  }
  0x26   : > { %704 = vmatmul.mubr.msk.f32.gmra.mrb[6].mxu0 %vm213_vm2, %v202_v16  ;;  %714 = vmatmul.mubr.msk.f32.gmra.mrb[6].mxu1 %vm213_vm2, %v202_v16 }
  0x27   : > { %335 = vmatprep.mubr.f32.mxu0 %v779_v5  ;;  %448 = vmatprep.mubr.f32.mxu1 %v779_v5 }
  0x28   : > { %513 = vperm.xlu0 %750, %v479_v17   ;;  %518 = vperm.xlu1 %751, %v480_v18  }
  0x2a   : > { %705 = vmatmul.mubr.msk.f32.gmra.mrb[8].mxu0 %vm213_vm2, %v203_v19  ;;  %715 = vmatmul.mubr.msk.f32.gmra.mrb[8].mxu1 %vm213_vm2, %v203_v19 }
  0x2b   : > { %341 = vmatprep.mubr.f32.mxu0 %v779_v5  ;;  %454 = vmatprep.mubr.f32.mxu1 %v779_v5 }
  0x2e   : > { %706 = vmatmul.mubr.msk.f32.gmra.mrb[10].mxu0 %vm213_vm2, %v204_v20  ;;  %716 = vmatmul.mubr.msk.f32.gmra.mrb[10].mxu1 %vm213_vm2, %v204_v20 }
  0x2f   : > { %347 = vmatprep.mubr.f32.mxu0 %v779_v5  ;;  %460 = vmatprep.mubr.f32.mxu1 %v779_v5 }
  0x32   : > { %707 = vmatmul.mubr.msk.f32.gmra.mrb[12].mxu0 %vm213_vm2, %v205_v21  ;;  %717 = vmatmul.mubr.msk.f32.gmra.mrb[12].mxu1 %vm213_vm2, %v205_v21 }
  0x33   : > { %353 = vmatprep.mubr.f32.mxu0 %v779_v5  ;;  %466 = vmatprep.mubr.f32.mxu1 %v779_v5 }
  0x36   : > { %708 = vmatmul.mubr.msk.f32.gmra.mrb[14].mxu0 %vm213_vm2, %v206_v22  ;;  %718 = vmatmul.mubr.msk.f32.gmra.mrb[14].mxu1 %vm213_vm2, %v206_v22 }
  0x9b   : > { %v484_v23 = vpop.permute.xlu0 %483  ;;  %v494_v34 = vpop.permute.xlu1 %493 }
  0x9f   : > { %v489_v31 = vpop.permute.xlu0 %488  ;;  %v499_v61 = vpop.permute.xlu1 %498 }
  0xa3   : > { %v504_v12 = vpop.permute.xlu0 %503 }
  0xed   : > { %v313_v24 = vpop.f32.mrb[0].mxu0  ;;  %v426_v25 = vpop.f32.mrb[0].mxu1 }
  0xee   : > { %v521_v26 = vsub.f32 %v313_v24, %v484_v23  ;;  %v315_v27 = vpop.f32.mrb[1].mxu0  ;;  %v523_v28 = vsub.f32 %v426_v25, %v484_v23  ;;  %v428_v29 = vpop.f32.mrb[1].mxu1 }
  0xef   : > { %v522_v30 = vsub.f32 %v315_v27, %v484_v23  ;;  %v524_v33 = vsub.f32 %v428_v29, %v484_v23 }
  0xf0   : > { %v561_v32 = vmul.f32 %v521_v26, %v521_v26  ;;  %v563_v36 = vmul.f32 %v523_v28, %v523_v28  ;;  %v509_v28 = vpop.permute.xlu1 %508 }
  0xf1   : > { %v562_v35 = vmul.f32 %v522_v30, %v522_v30  ;;  %v319_v37 = vpop.f32.mrb[2].mxu0  ;;  %v432_v38 = vpop.f32.mrb[2].mxu1  ;;  %v564_v45 = vmul.f32 %v524_v33, %v524_v33 }
  0xf2   : > { %v525_v39 = vsub.f32 %v319_v37, %v489_v31  ;;  %v321_v40 = vpop.f32.mrb[3].mxu0  ;;  %v527_v41 = vsub.f32 %v432_v38, %v489_v31  ;;  %v434_v42 = vpop.f32.mrb[3].mxu1 }
  0xf3   : > { %v593_v43 = vadd.f32 %v562_v35, %v561_v32  ;;  %v526_v44 = vsub.f32 %v321_v40, %v489_v31  ;;  %v528_v50 = vsub.f32 %v434_v42, %v489_v31 }
  0xf4   : > { %v565_v46 = vmul.f32 %v525_v39, %v525_v39  ;;  %v567_v49 = vmul.f32 %v527_v41, %v527_v41 }
  0xf5   : > { %v594_v47 = vadd.f32 %v593_v43, %v563_v36  ;;  %v566_v48 = vmul.f32 %v526_v44, %v526_v44  ;;  %v325_v51 = vpop.f32.mrb[4].mxu0  ;;  %v438_v52 = vpop.f32.mrb[4].mxu1  ;;  %v568_v0 = vmul.f32 %v528_v50, %v528_v50 }
  0xf6   : > { %v529_v53 = vsub.f32 %v325_v51, %v494_v34  ;;  %v327_v54 = vpop.f32.mrb[5].mxu0  ;;  %v531_v55 = vsub.f32 %v438_v52, %v494_v34  ;;  %v440_v56 = vpop.f32.mrb[5].mxu1 }
  0xf7   : > { %v598_v57 = vadd.f32 %v566_v48, %v565_v46  ;;  %v530_v58 = vsub.f32 %v327_v54, %v494_v34  ;;  %v595_v59 = vadd.f32 %v594_v47, %v564_v45  ;;  %v532_v62 = vsub.f32 %v440_v56, %v494_v34  ;;  %v514_v44 = vpop.permute.xlu0 %513 }
  0xf8   : > { %v569_v60 = vmul.f32 %v529_v53, %v529_v53  ;;  %v571_v2 = vmul.f32 %v531_v55, %v531_v55 }
  0xf9   : > { %v599_v63 = vadd.f32 %v598_v57, %v567_v49  ;;  %v570_v1 = vmul.f32 %v530_v58, %v530_v58  ;;  %596 = vadd.xlane.f32.xlu0 %v595_v59  ;;  %v331_v3 = vpop.f32.mrb[6].mxu0  ;;  %v444_v4 = vpop.f32.mrb[6].mxu1  ;;  %v572_v13 = vmul.f32 %v532_v62, %v532_v62 }
  0xfa   : > { %v533_v5 = vsub.f32 %v331_v3, %v499_v61  ;;  %v333_v6 = vpop.f32.mrb[7].mxu0  ;;  %v535_v7 = vsub.f32 %v444_v4, %v499_v61  ;;  %v446_v8 = vpop.f32.mrb[7].mxu1 }
  0xfb   : > { %v603_v9 = vadd.f32 %v570_v1, %v569_v60  ;;  %v534_v10 = vsub.f32 %v333_v6, %v499_v61  ;;  %v600_v11 = vadd.f32 %v599_v63, %v568_v0  ;;  %v536_v18 = vsub.f32 %v446_v8, %v499_v61  ;;  %v519_v60 = vpop.permute.xlu1 %518 }
  0xfc   : > { %v573_v14 = vmul.f32 %v533_v5, %v533_v5  ;;  %v575_v17 = vmul.f32 %v535_v7, %v535_v7 }
  0xfd   : > { %v604_v15 = vadd.f32 %v603_v9, %v571_v2  ;;  %v574_v16 = vmul.f32 %v534_v10, %v534_v10  ;;  %v450_v19 = vpop.f32.mrb[8].mxu1  ;;  %601 = vadd.xlane.f32.xlu1 %v600_v11  ;;  %v337_v20 = vpop.f32.mrb[8].mxu0  ;;  %v576_v31 = vmul.f32 %v536_v18, %v536_v18 }
  0xfe   : > { %v539_v21 = vsub.f32 %v450_v19, %v504_v12  ;;  %v537_v22 = vsub.f32 %v337_v20, %v504_v12  ;;  %v339_v23 = vpop.f32.mrb[9].mxu0  ;;  %v452_v24 = vpop.f32.mrb[9].mxu1 }
  0xff   : > { %v608_v25 = vadd.f32 %v574_v16, %v573_v14  ;;  %v538_v26 = vsub.f32 %v339_v23, %v504_v12  ;;  %v605_v27 = vadd.f32 %v604_v15, %v572_v13  ;;  %v540_v33 = vsub.f32 %v452_v24, %v504_v12  ;;  %v553_v23 = vld [vmem:[%s978_s3] sm:$0xff] }
 0x100   : > { %v577_v29 = vmul.f32 %v537_v22, %v537_v22  ;;  %v579_v36 = vmul.f32 %v539_v21, %v539_v21 }
 0x101   : > { %v609_v30 = vadd.f32 %v608_v25, %v575_v17  ;;  %v578_v32 = vmul.f32 %v538_v26, %v538_v26  ;;  %v456_v34 = vpop.f32.mrb[10].mxu1  ;;  %606 = vadd.xlane.f32.xlu0 %v605_v27  ;;  %v343_v35 = vpop.f32.mrb[10].mxu0  ;;  %v580_v46 = vmul.f32 %v540_v33, %v540_v33  ;;  %v554_v26 = vld [vmem:[%s978_s3 + $0x8] sm:$0xff] }
 0x102   : > { %v541_v37 = vsub.f32 %v343_v35, %v509_v28  ;;  %v345_v38 = vpop.f32.mrb[11].mxu0  ;;  %v458_v39 = vpop.f32.mrb[11].mxu1  ;;  %v543_v41 = vsub.f32 %v456_v34, %v509_v28  ;;  %v557_v35 = vld [vmem:[%s978_s3 + $0x20] sm:$0xff] }
 0x103   : > { %v613_v40 = vadd.f32 %v578_v32, %v577_v29  ;;  %v542_v42 = vsub.f32 %v345_v38, %v509_v28  ;;  %v610_v43 = vadd.f32 %v609_v30, %v576_v31  ;;  %v544_v48 = vsub.f32 %v458_v39, %v509_v28  ;;  %v555_v29 = vld [vmem:[%s978_s3 + $0x10] sm:$0xff]  ;;  %v556_v32 = vld [vmem:[%s978_s3 + $0x18] sm:$0xff]  ;;  %v558_v38 = vld [vmem:[%s978_s3 + $0x28] sm:$0xff] }
 0x104   : > { %v581_v45 = vmul.f32 %v541_v37, %v541_v37  ;;  %v583_v56 = vmul.f32 %v543_v41, %v543_v41  ;;  %v559_v41 = vld [vmem:[%s978_s3 + $0x30] sm:$0xff] }
 0x105   : > { %v582_v47 = vmul.f32 %v542_v42, %v542_v42  ;;  %v462_v49 = vpop.f32.mrb[12].mxu1  ;;  %611 = vadd.xlane.f32.xlu0 %v610_v43  ;;  %v349_v50 = vpop.f32.mrb[12].mxu0  ;;  %v614_v51 = vadd.f32 %v613_v40, %v579_v36  ;;  %v584_v62 = vmul.f32 %v544_v48, %v544_v48 }
 0x106   : > { %v547_v52 = vsub.f32 %v462_v49, %v514_v44  ;;  %v545_v53 = vsub.f32 %v349_v50, %v514_v44  ;;  %v351_v54 = vpop.f32.mrb[13].mxu0  ;;  %v464_v55 = vpop.f32.mrb[13].mxu1 }
 0x107   : > { %v618_v57 = vadd.f32 %v582_v47, %v581_v45  ;;  %v546_v58 = vsub.f32 %v351_v54, %v514_v44  ;;  %v615_v59 = vadd.f32 %v614_v51, %v580_v46  ;;  %v548_v0 = vsub.f32 %v464_v55, %v514_v44  ;;  %v560_v44 = vld [vmem:[%s978_s3 + $0x38] sm:$0xff] }
 0x108   : > { %v585_v61 = vmul.f32 %v545_v53, %v545_v53  ;;  %v587_v4 = vmul.f32 %v547_v52, %v547_v52 }
 0x109   : > { %v586_v63 = vmul.f32 %v546_v58, %v546_v58  ;;  %v468_v1 = vpop.f32.mrb[14].mxu1  ;;  %616 = vadd.xlane.f32.xlu1 %v615_v59  ;;  %v355_v2 = vpop.f32.mrb[14].mxu0  ;;  %v619_v3 = vadd.f32 %v618_v57, %v583_v56  ;;  %v588_v13 = vmul.f32 %v548_v0, %v548_v0 }
 0x10a   : > { %v549_v5 = vsub.f32 %v355_v2, %v519_v60  ;;  %v357_v6 = vpop.f32.mrb[15].mxu0  ;;  %v470_v7 = vpop.f32.mrb[15].mxu1  ;;  %v551_v9 = vsub.f32 %v468_v1, %v519_v60 }
 0x10b   : > { %v623_v8 = vadd.f32 %v586_v63, %v585_v61  ;;  %v550_v10 = vsub.f32 %v357_v6, %v519_v60  ;;  %v620_v11 = vadd.f32 %v619_v3, %v584_v62  ;;  %v552_v15 = vsub.f32 %v470_v7, %v519_v60 }
 0x10c   : > { %v589_v12 = vmul.f32 %v549_v5, %v549_v5  ;;  %v591_v17 = vmul.f32 %v551_v9, %v551_v9 }
 0x10d   : > { %v590_v14 = vmul.f32 %v550_v10, %v550_v10  ;;  %621 = vadd.xlane.f32.xlu0 %v620_v11  ;;  %v624_v16 = vadd.f32 %v623_v8, %v587_v4  ;;  %v592_v20 = vmul.f32 %v552_v15, %v552_v15 }
 0x10f   : > { %v628_v18 = vadd.f32 %v590_v14, %v589_v12  ;;  %v625_v19 = vadd.f32 %v624_v16, %v588_v13 }
 0x111   : > { %626 = vadd.xlane.f32.xlu1 %v625_v19  ;;  %v629_v21 = vadd.f32 %v628_v18, %v591_v17 }
 0x113   : > { %v630_v22 = vadd.f32 %v629_v21, %v592_v20 }
 0x115   : > { %631 = vadd.xlane.f32.xlu0 %v630_v22 }
 0x186   : > { %v597_v24 = vpop.xlane.xlu0 %596 }
 0x187   : > { %v633_v25 = vadd.f32 %v597_v24, %v553_v23 }
 0x189   : > { %642 = vst.msk [vmem:[%s978_s3] sm:$0xff] %vm641_vm3, %v633_v25 }
 0x18a   : > { %v602_v27 = vpop.xlane.xlu1 %601 }
 0x18b   : > { %v634_v28 = vadd.f32 %v602_v27, %v554_v26 }
 0x18d   : > { %643 = vst.msk [vmem:[%s978_s3 + $0x8] sm:$0xff] %vm641_vm3, %v634_v28 }
 0x18e   : > { %v607_v30 = vpop.xlane.xlu0 %606 }
 0x18f   : > { %v635_v31 = vadd.f32 %v607_v30, %v555_v29 }
 0x191   : > { %644 = vst.msk [vmem:[%s978_s3 + $0x10] sm:$0xff] %vm641_vm3, %v635_v31 }
 0x192   : > { %v612_v33 = vpop.xlane.xlu0 %611 }
 0x193   : > { %v636_v34 = vadd.f32 %v612_v33, %v556_v32 }
 0x195   : > { %645 = vst.msk [vmem:[%s978_s3 + $0x18] sm:$0xff] %vm641_vm3, %v636_v34 }
 0x196   : > { %v617_v36 = vpop.xlane.xlu1 %616 }
 0x197   : > { %v637_v37 = vadd.f32 %v617_v36, %v557_v35 }
 0x199   : > { %646 = vst.msk [vmem:[%s978_s3 + $0x20] sm:$0xff] %vm641_vm3, %v637_v37 }
 0x19a   : > { %v622_v39 = vpop.xlane.xlu0 %621 }
 0x19b   : > { %v638_v40 = vadd.f32 %v622_v39, %v558_v38 }
 0x19d   : > { %647 = vst.msk [vmem:[%s978_s3 + $0x28] sm:$0xff] %vm641_vm3, %v638_v40 }
 0x19e   : > { %v627_v42 = vpop.xlane.xlu1 %626 }
 0x19f   : > { %v639_v43 = vadd.f32 %v627_v42, %v559_v41 }
 0x1a1   : > { %648 = vst.msk [vmem:[%s978_s3 + $0x30] sm:$0xff] %vm641_vm3, %v639_v43 }
 0x1a2   : > { %v632_v45 = vpop.xlane.xlu0 %631 }
 0x1a3   : > { %v640_v46 = vadd.f32 %v632_v45, %v560_v44 }
 0x1a5   : > { %649 = vst.msk [vmem:[%s978_s3 + $0x38] sm:$0xff] %vm641_vm3, %v640_v46 }
 0x1a6 PF: > { %s13_s14 = sadd.s32 1, %s776_s14   ;;  %s979_s12 = smov %s772_s13 }
 0x1a7   : > { %p10_p6 = scmp.ge.s32.totalorder %s13_s14, 4   ;;  %s980_s13 = smov %s982_s15 }
 0x1a9   :  { %12 = sbr.rel (!%p10_p6) target bundleno = 2 (0x2), region = 62 }

</bundles_post_ra>
